<compile_context>
chip_gen: v5e
topology: v5e:2x2
jax: 0.10.0
libtpu: 0.0.40
codegen_flags: <defaults>
</compile_context>

<pallas_src>
import jax
import jax.numpy as jnp
from jax.experimental import pallas as pl
from jax.experimental.pallas import tpu as pltpu


def _round_up(x: int, m: int) -> int:
    return ((x + m - 1) // m) * m


def _cdiv(a: int, b: int) -> int:
    return -(-a // b)


def _fused_mlp_kernel(z_ref, w1_ref, b1_ref, w2_ref, b2_ref, w3_ref, b3_ref, o_ref):
    """out = ReLU(ReLU(z @ W1 + b1) @ W2 + b2) @ W3 + b3, all in VMEM/vregs.

    Weights are bf16 (native MXU dtype); matmuls accumulate in f32 via
    preferred_element_type, and all elementwise math stays in f32.
    """
    x = z_ref[...].astype(w1_ref.dtype)
    h = jnp.dot(x, w1_ref[...], preferred_element_type=jnp.float32)
    h = jnp.maximum(h + b1_ref[...], 0.0)
    h = jnp.dot(h.astype(w2_ref.dtype), w2_ref[...], preferred_element_type=jnp.float32)
    h = jnp.maximum(h + b2_ref[...], 0.0)
    y = jnp.dot(h.astype(w3_ref.dtype), w3_ref[...], preferred_element_type=jnp.float32)
    o_ref[...] = (y + b3_ref[...]).astype(o_ref.dtype)


def fused_decoder_forward(z, padded_params, x_dim, *, batch_tile=512):
    """Run the fused 3-layer decoder MLP.

    `padded_params`: [(w1,b1),(w2,b2),(w3,b3)] with bf16 weights laid out
    (in_features, out_features) and f32 biases (1, out_features); hidden/output
    feature dims zero-padded to multiples of 128, layer-1 input rows padded
    only to a multiple of 8.
    """
    (w1, b1), (w2, b2), (w3, b3) = padded_params
    B, z_dim = z.shape
    Kp, H1p = w1.shape
    H2p = w2.shape[1]
    Xp = w3.shape[1]

    # Sublane-align the latent dim only if needed (usually a no-op; padded w1
    # rows are zero so numerics are exact).
    if z_dim < Kp:
        z = jnp.pad(z, ((0, 0), (0, Kp - z_dim)))

    # Batch tiling: fix the number of grid steps first, then use the smallest
    # 8-aligned tile that covers B (pads <= 7 rows instead of up to a full tile).
    n_steps = max(1, _cdiv(B, batch_tile))
    tb = _round_up(_cdiv(B, n_steps), 8)
    Bp = tb * n_steps
    if Bp != B:
        z = jnp.pad(z, ((0, Bp - B), (0, 0)))

    out = pl.pallas_call(
        _fused_mlp_kernel,
        out_shape=jax.ShapeDtypeStruct((Bp, Xp), jnp.float32),
        grid=(n_steps,),
        in_specs=[
            pl.BlockSpec((tb, Kp), lambda i: (i, 0)),      # activation tile per step
            pl.BlockSpec((Kp, H1p), lambda i: (0, 0)),     # weights/biases resident
            pl.BlockSpec((1, H1p), lambda i: (0, 0)),
            pl.BlockSpec((H1p, H2p), lambda i: (0, 0)),
            pl.BlockSpec((1, H2p), lambda i: (0, 0)),
            pl.BlockSpec((H2p, Xp), lambda i: (0, 0)),
            pl.BlockSpec((1, Xp), lambda i: (0, 0)),
        ],
        out_specs=pl.BlockSpec((tb, Xp), lambda i: (i, 0)),
        compiler_params=pltpu.CompilerParams(
            # Batch tiles are independent -> shardable across TCs (v7x megacore).
            dimension_semantics=("parallel",),
        ),
    )(z, w1, b1, w2, b2, w3, b3)

    return out[:B, :x_dim]


class PallasDecoder:
    """JAX/Pallas port of aae.layer.Decoder (default config: ReLU hidden
    activation, no batch_norm, no dropout, no output activation)."""

    def __init__(self, dims, key, *, feature_pad=128):
        z_dim, h_dims, x_dim = dims
        self.x_dim = x_dim
        layer_sizes = [z_dim] + list(h_dims) + [x_dim]
        assert len(layer_sizes) == 4, "fused kernel expects exactly two hidden layers"

        # Deterministic parameter init (PyTorch-Linear-like uniform bounds),
        # stored as (in, out) == torch weight (out, in) transposed.
        self.params = []
        for i in range(1, len(layer_sizes)):
            fan_in, fan_out = layer_sizes[i - 1], layer_sizes[i]
            key, kw, kb = jax.random.split(key, 3)
            bound = 1.0 / (fan_in ** 0.5)
            w = jax.random.uniform(kw, (fan_in, fan_out), jnp.float32,
                                   minval=-bound, maxval=bound)
            b = jax.random.uniform(kb, (fan_out,), jnp.float32,
                                   minval=-bound, maxval=bound)
            self.params.append((w, b))

        # Padded copies for the fused kernel, built once:
        #   - layer-1 input rows padded only to a multiple of 8 (sublane),
        #   - hidden/output out-feature dims padded to multiples of 128 (lane),
        #   - weights cast to bf16 (MXU-native), biases kept f32 as (1, D).
        in_pads = [_round_up(z_dim, 8)] + [_round_up(s, feature_pad) for s in layer_sizes[1:-1]]
        out_pads = [_round_up(s, feature_pad) for s in layer_sizes[1:]]
        self.padded_params = []
        for (w, b), din_p, dout_p in zip(self.params, in_pads, out_pads):
            wp = jnp.zeros((din_p, dout_p), jnp.float32)
            wp = wp.at[: w.shape[0], : w.shape[1]].set(w).astype(jnp.bfloat16)
            bp = jnp.zeros((1, dout_p), jnp.float32)
            bp = bp.at[0, : b.shape[0]].set(b)
            self.padded_params.append((wp, bp))

        # TODO(synk): batch_norm / dropout / output_activation branches of the
        # original module are not exercised by the default constructor args and
        # are not implemented here.

    def __call__(self, z):
        return fused_decoder_forward(z, self.padded_params, self.x_dim)

    def reference(self, z):
        """Pure-JAX f32 reference (unpadded) for correctness checking."""
        x = z
        n_layers = len(self.params)
        for idx, (w, b) in enumerate(self.params):
            x = x @ w + b
            if idx != n_layers - 1:
                x = jnp.maximum(x, 0.0)
        return x


if __name__ == "__main__":
    key = jax.random.PRNGKey(0)
    k_z, k_params, k_z2, k_z3 = jax.random.split(key, 4)

    # Small shapes: latent 32 -> hidden [64, 64] -> output 128.
    dims = [32, [64, 64], 128]
    decoder = PallasDecoder(dims, k_params)

    # bf16 matmul operands (f32 accumulate) -> compare to the f32 reference
    # with correspondingly loose tolerances.
    ATOL, RTOL = 3e-2, 3e-2

    # Tiny batch: grid=(1,), no padding at all.
    z = jax.random.normal(k_z, (8, dims[0]), dtype=jnp.float32)
    out = jax.block_until_ready(decoder(z))
    ref = decoder.reference(z)
    assert out.shape == (8, dims[2]), out.shape
    assert jnp.allclose(out, ref, atol=ATOL, rtol=RTOL), "mismatch vs reference (B=8)"

    # Awkward batch (300): single grid step, tile=304, only 4 padded rows.
    z2 = jax.random.normal(k_z2, (300, dims[0]), dtype=jnp.float32)
    out2 = jax.block_until_ready(decoder(z2))
    ref2 = decoder.reference(z2)
    assert out2.shape == (300, dims[2]), out2.shape
    assert jnp.allclose(out2, ref2, atol=ATOL, rtol=RTOL), "mismatch vs reference (B=300)"

    # Larger batch (600): exercises the multi-step 'parallel' grid (2 x 304 tile).
    z3 = jax.random.normal(k_z3, (600, dims[0]), dtype=jnp.float32)
    out3 = jax.block_until_ready(decoder(z3))
    ref3 = decoder.reference(z3)
    assert out3.shape == (600, dims[2]), out3.shape
    assert jnp.allclose(out3, ref3, atol=ATOL, rtol=RTOL), "mismatch vs reference (B=600)"

    print("KERNEL_OK")
</pallas_src>

<mosaic_0001>
module attributes {stable_mosaic.version = 11 : i64} {
  func.func @_fused_mlp_kernel(%arg0: i32, %arg1: memref<8x32xf32, #tpu.memory_space<vmem>>, %arg2: memref<32x128xbf16, #tpu.memory_space<vmem>>, %arg3: memref<1x128xf32, #tpu.memory_space<vmem>>, %arg4: memref<128x128xbf16, #tpu.memory_space<vmem>>, %arg5: memref<1x128xf32, #tpu.memory_space<vmem>>, %arg6: memref<128x128xbf16, #tpu.memory_space<vmem>>, %arg7: memref<1x128xf32, #tpu.memory_space<vmem>>, %arg8: memref<8x128xf32, #tpu.memory_space<vmem>>) attributes {dimension_semantics = [#tpu.dimension_semantics<parallel>], iteration_bounds = array<i64: 1>, scalar_prefetch = 0 : i64, scratch_operands = 0 : i64, tpu.core_type = #tpu.core_type<tc>, window_params = [{transform_indices = @transform_0, window_bounds = array<i64: 8, 32>}, {pipeline_mode = #tpu.pipeline_mode<synchronous>, transform_indices = @transform_1, window_bounds = array<i64: 32, 128>}, {pipeline_mode = #tpu.pipeline_mode<synchronous>, transform_indices = @transform_2, window_bounds = array<i64: 1, 128>}, {pipeline_mode = #tpu.pipeline_mode<synchronous>, transform_indices = @transform_3, window_bounds = array<i64: 128, 128>}, {pipeline_mode = #tpu.pipeline_mode<synchronous>, transform_indices = @transform_4, window_bounds = array<i64: 1, 128>}, {pipeline_mode = #tpu.pipeline_mode<synchronous>, transform_indices = @transform_5, window_bounds = array<i64: 128, 128>}, {pipeline_mode = #tpu.pipeline_mode<synchronous>, transform_indices = @transform_6, window_bounds = array<i64: 1, 128>}, {transform_indices = @transform_7, window_bounds = array<i64: 8, 128>}]} {
    %c0 = arith.constant 0 : index
    %c0_0 = arith.constant 0 : index
    %0 = vector.load %arg1[%c0, %c0_0] : memref<8x32xf32, #tpu.memory_space<vmem>>, vector<8x32xf32>
    %1 = arith.truncf %0 : vector<8x32xf32> to vector<8x32xbf16>
    %c0_1 = arith.constant 0 : index
    %c0_2 = arith.constant 0 : index
    %2 = vector.load %arg2[%c0_1, %c0_2] : memref<32x128xbf16, #tpu.memory_space<vmem>>, vector<32x128xbf16>
    %cst = arith.constant dense<0.000000e+00> : vector<8x128xf32>
    %3 = tpu.matmul %1, %2, %cst {dimension_numbers = #tpu.dot_dimension_numbers<[1], [0], [0], [1], [0, 0, 1, 1], [], []>} : vector<8x32xbf16>, vector<32x128xbf16>, vector<8x128xf32> -> vector<8x128xf32>
    %c0_3 = arith.constant 0 : index
    %c0_4 = arith.constant 0 : index
    %4 = vector.load %arg3[%c0_3, %c0_4] : memref<1x128xf32, #tpu.memory_space<vmem>>, vector<1x128xf32>
    %5 = vector.broadcast %4 : vector<1x128xf32> to vector<8x128xf32>
    %6 = arith.addf %3, %5 : vector<8x128xf32>
    %cst_5 = arith.constant 0.000000e+00 : f32
    %7 = vector.broadcast %cst_5 : f32 to vector<8x128xf32>
    %8 = arith.maximumf %6, %7 : vector<8x128xf32>
    %9 = arith.truncf %8 : vector<8x128xf32> to vector<8x128xbf16>
    %c0_6 = arith.constant 0 : index
    %c0_7 = arith.constant 0 : index
    %10 = vector.load %arg4[%c0_6, %c0_7] : memref<128x128xbf16, #tpu.memory_space<vmem>>, vector<128x128xbf16>
    %cst_8 = arith.constant dense<0.000000e+00> : vector<8x128xf32>
    %11 = tpu.matmul %9, %10, %cst_8 {dimension_numbers = #tpu.dot_dimension_numbers<[1], [0], [0], [1], [0, 0, 1, 1], [], []>} : vector<8x128xbf16>, vector<128x128xbf16>, vector<8x128xf32> -> vector<8x128xf32>
    %c0_9 = arith.constant 0 : index
    %c0_10 = arith.constant 0 : index
    %12 = vector.load %arg5[%c0_9, %c0_10] : memref<1x128xf32, #tpu.memory_space<vmem>>, vector<1x128xf32>
    %13 = vector.broadcast %12 : vector<1x128xf32> to vector<8x128xf32>
    %14 = arith.addf %11, %13 : vector<8x128xf32>
    %cst_11 = arith.constant 0.000000e+00 : f32
    %15 = vector.broadcast %cst_11 : f32 to vector<8x128xf32>
    %16 = arith.maximumf %14, %15 : vector<8x128xf32>
    %17 = arith.truncf %16 : vector<8x128xf32> to vector<8x128xbf16>
    %c0_12 = arith.constant 0 : index
    %c0_13 = arith.constant 0 : index
    %18 = vector.load %arg6[%c0_12, %c0_13] : memref<128x128xbf16, #tpu.memory_space<vmem>>, vector<128x128xbf16>
    %cst_14 = arith.constant dense<0.000000e+00> : vector<8x128xf32>
    %19 = tpu.matmul %17, %18, %cst_14 {dimension_numbers = #tpu.dot_dimension_numbers<[1], [0], [0], [1], [0, 0, 1, 1], [], []>} : vector<8x128xbf16>, vector<128x128xbf16>, vector<8x128xf32> -> vector<8x128xf32>
    %c0_15 = arith.constant 0 : index
    %c0_16 = arith.constant 0 : index
    %20 = vector.load %arg7[%c0_15, %c0_16] : memref<1x128xf32, #tpu.memory_space<vmem>>, vector<1x128xf32>
    %21 = vector.broadcast %20 : vector<1x128xf32> to vector<8x128xf32>
    %22 = arith.addf %19, %21 : vector<8x128xf32>
    %c0_17 = arith.constant 0 : index
    %c0_18 = arith.constant 0 : index
    %23 = vector.load %arg8[%c0_17, %c0_18] : memref<8x128xf32, #tpu.memory_space<vmem>>, vector<8x128xf32>
    tpu.vector_store %arg8[%c0_17, %c0_18], %22 {strides = array<i32>} : memref<8x128xf32, #tpu.memory_space<vmem>>, vector<8x128xf32>,
    return
  }
  func.func @transform_0(%arg0: i32) -> (i32, i32) {
    %c0_i32 = arith.constant 0 : i32
    %c0_i32_0 = arith.constant 0 : i32
    return %arg0, %c0_i32 : i32, i32
  }
  func.func @transform_1(%arg0: i32) -> (i32, i32) {
    %c0_i32 = arith.constant 0 : i32
    %c0_i32_0 = arith.constant 0 : i32
    %c0_i32_1 = arith.constant 0 : i32
    return %c0_i32, %c0_i32_0 : i32, i32
  }
  func.func @transform_2(%arg0: i32) -> (i32, i32) {
    %c0_i32 = arith.constant 0 : i32
    %c0_i32_0 = arith.constant 0 : i32
    %c0_i32_1 = arith.constant 0 : i32
    return %c0_i32, %c0_i32_0 : i32, i32
  }
  func.func @transform_3(%arg0: i32) -> (i32, i32) {
    %c0_i32 = arith.constant 0 : i32
    %c0_i32_0 = arith.constant 0 : i32
    %c0_i32_1 = arith.constant 0 : i32
    return %c0_i32, %c0_i32_0 : i32, i32
  }
  func.func @transform_4(%arg0: i32) -> (i32, i32) {
    %c0_i32 = arith.constant 0 : i32
    %c0_i32_0 = arith.constant 0 : i32
    %c0_i32_1 = arith.constant 0 : i32
    return %c0_i32, %c0_i32_0 : i32, i32
  }
  func.func @transform_5(%arg0: i32) -> (i32, i32) {
    %c0_i32 = arith.constant 0 : i32
    %c0_i32_0 = arith.constant 0 : i32
    %c0_i32_1 = arith.constant 0 : i32
    return %c0_i32, %c0_i32_0 : i32, i32
  }
  func.func @transform_6(%arg0: i32) -> (i32, i32) {
    %c0_i32 = arith.constant 0 : i32
    %c0_i32_0 = arith.constant 0 : i32
    %c0_i32_1 = arith.constant 0 : i32
    return %c0_i32, %c0_i32_0 : i32, i32
  }
  func.func @transform_7(%arg0: i32) -> (i32, i32) {
    %c0_i32 = arith.constant 0 : i32
    %c0_i32_0 = arith.constant 0 : i32
    return %arg0, %c0_i32 : i32, i32
  }
}

</mosaic_0001>

<bundles_post_ra>
// kernel: tpu_custom_call.1
= control target key start
LH: loop header
LB: loop body
LE: loop exit
PB: predicated region body
PF: predicated region fallthrough
CT: control target
= control target key end

     0   :  { %12 = vsyncpa [#allocation3], 0  ;;  %s614_s0 = inlined_call_operand.hbm [shape: f32[8,32], index: 0, kind: input, shape index: {}]   ;;  %s615_s1 = inlined_call_operand.hbm [shape: bf16[32,128], index: 1, kind: input, shape index: {}]   ;;  %s616_s2 = inlined_call_operand.vmem [shape: f32[1,128], index: 2, kind: input, shape index: {}]   ;;  %s617_s3 = inlined_call_operand.hbm [shape: bf16[128,128], index: 3, kind: input, shape index: {}]   ;;  %s618_s4 = inlined_call_operand.vmem [shape: f32[1,128], index: 4, kind: input, shape index: {}]   ;;  %s619_s5 = inlined_call_operand.hbm [shape: bf16[128,128], index: 5, kind: input, shape index: {}]   ;;  %s620_s6 = inlined_call_operand.vmem [shape: f32[1,128], index: 6, kind: input, shape index: {}]   ;;  %s621_s7 = inlined_call_operand.hbm [shape: f32[8,128], index: 7, kind: output, shape index: {}]  }
   0x1   :  { %13 = vsyncpa [#allocation6], 0 }
   0x2   :  { %14 = vsyncpa [#allocation9], 0  ;;  %s31_s26 = sshll.u32 %s615_s1, 4  ;;  %s32_s26 = int_to_ptr.hbm [resolvable:$true] %s31_s26 }
   0x3   :  { %15 = vsyncpa [#allocation4], 0  ;;  %s543_s27 = smov [#allocation5]   ;;  %s21_s8 = sshll.u32 %s614_s0, 4  ;;  %s22_s8 = int_to_ptr.hbm [resolvable:$true] %s21_s8 }
   0x4   :  { %s33_s28 = sshll.u32 %s543_s27, 4  ;;  %s544_s9 = smov 64   ;;  %s34_s28 = int_to_ptr.vmem [resolvable:$true] %s33_s28 }
   0x5   :  { %s545_s10 = smov 4   ;;  %s546_s11 = smov [#allocation2]  }
   0x6   :  { %39 = dma.hbm_to_vmem [thread:$0]  %s32_s26, 256, %s34_s28, [#allocation6], %s544_s9, %s544_s9, %s545_s10  }
   0x7   :  { %s23_s12 = sshll.u32 %s546_s11, 4  ;;  %s46_s15 = sshll.u32 %s617_s3, 4  ;;  %s24_s12 = int_to_ptr.vmem [resolvable:$true] %s23_s12  ;;  %s47_s15 = int_to_ptr.hbm [resolvable:$true] %s46_s15 }
   0x8   :  { %26 = dma.hbm_to_vmem [thread:$0]  %s22_s8, 128, %s24_s12, [#allocation3]  }
   0x9   :  { %s61_s17 = sshll.u32 %s619_s5, 4  ;;  %s547_s18 = smov [#allocation7]   ;;  %s62_s17 = int_to_ptr.hbm [resolvable:$true] %s61_s17 }
   0xa   :  { %s48_s19 = sshll.u32 %s547_s18, 4  ;;  %s548_s0 = smov [#allocation8]   ;;  %s49_s19 = int_to_ptr.vmem [resolvable:$true] %s48_s19 }
   0xb   :  { %54 = dma.hbm_to_vmem [thread:$0]  %s47_s15, 1024, %s49_s19, [#allocation6], %s544_s9, %s544_s9, %s545_s10  }
   0xc   :  { %s63_s20 = sshll.u32 %s548_s0, 4  ;;  %s64_s20 = int_to_ptr.vmem [resolvable:$true] %s63_s20 }
   0xd   :  { %69 = dma.hbm_to_vmem [thread:$0]  %s62_s17, 1024, %s64_s20, [#allocation9], %s544_s9, %s544_s9, %s545_s10  }
   0xe   :  { %535 = dma.done.wait [#allocation3], 128  }
   0xf   :  { %536 = vsyncadd [#allocation3], 4294967168 }
  0x10   :  { %537 = dma.done.wait [#allocation6], 1280  }
  0x11   :  { %538 = vsyncadd [#allocation6], 4294966016 }
  0x12   :  { %539 = dma.done.wait [#allocation9], 1024  }
  0x13   :  { %540 = vsyncadd [#allocation9], 4294966272  ;;  %v388_v0 = vld [vmem:[#allocation5 + $0x8] sm:$0xff]  ;;  %v387_v2 = vld [vmem:[#allocation5] sm:$0xff]  ;;  %vm111_vm0 = vcmask 261120   ;;  %s549_s24 = smov [#allocation10]  }
  0x14   :  { %v396_v1 = vld [vmem:[#allocation7 + $0x38] sm:$0xff]  ;;  %121 = vmatpush.bf16.msra.mxu0 %v388_v0  ;;  %v89_v3 = vld [vmem:[#allocation2] sm:$0xff]  ;;  %v395_v4 = vld [vmem:[#allocation7 + $0x30] sm:$0xff]  ;;  %s300_s25 = sshll.u32 %s549_s24, 4  ;;  %s302_s28 = sshll.u32 %s621_s7, 4  ;;  %s301_s25 = int_to_ptr.vmem [resolvable:$true] %s300_s25  ;;  %s303_s28 = int_to_ptr.hbm [resolvable:$true] %s302_s28 }
  0x15   :  { %198 = vmatpush.bf16.msra.mxu1 %v396_v1  ;;  %v90_v5 = vpack.c.bf16 %v89_v3, %v89_v3  ;;  %v394_v6 = vld [vmem:[#allocation7 + $0x28] sm:$0xff]  ;;  %v393_v7 = vld [vmem:[#allocation7 + $0x20] sm:$0xff]  ;;  %v392_v8 = vld [vmem:[#allocation7 + $0x18] sm:$0xff] }
  0x16   :  { %v391_v9 = vld [vmem:[#allocation7 + $0x10] sm:$0xff]  ;;  %v390_v10 = vld [vmem:[#allocation7 + $0x8] sm:$0xff]  ;;  %v389_v11 = vld [vmem:[#allocation7] sm:$0xff] }
  0x17   :  { %v404_v12 = vld [vmem:[#allocation8 + $0x38] sm:$0xff]  ;;  %v403_v13 = vld [vmem:[#allocation8 + $0x30] sm:$0xff]  ;;  %v402_v14 = vld [vmem:[#allocation8 + $0x28] sm:$0xff] }
  0x18   :  { %122 = vmatpush.bf16.msra.mxu0 %v387_v2  ;;  %281 = vmatpush.bf16.msra.mxu2 %v404_v12  ;;  %v401_v15 = vld [vmem:[#allocation8 + $0x20] sm:$0xff]  ;;  %v400_v16 = vld [vmem:[#allocation8 + $0x18] sm:$0xff]  ;;  %v399_v17 = vld [vmem:[#allocation8 + $0x10] sm:$0xff] }
  0x19   :  { %199 = vmatpush.bf16.msra.mxu1 %v395_v4  ;;  %v412_v18 = vld [vmem:[%s616_s2] ss:$0 sm:$0xff]  ;;  %v397_v25 = vld [vmem:[#allocation8] sm:$0xff] }
  0x1a   :  { %v398_v24 = vld [vmem:[#allocation8 + $0x8] sm:$0xff] }
  0x1b   :  { %322 = vmatmul.msk.bf16.vlgmr.msra.gmra.mxu0 %vm111_vm0, %v90_v5  ;;  %v413_v26 = vld [vmem:[%s618_s4] ss:$0 sm:$0xff] }
  0x1c   :  { %282 = vmatpush.bf16.msra.mxu2 %v403_v13  ;;  %v414_v32 = vld [vmem:[%s620_s6] ss:$0 sm:$0xff] }
  0x1d   :  { %200 = vmatpush.bf16.msra.mxu1 %v394_v6 }
  0x20   :  { %283 = vmatpush.bf16.msra.mxu2 %v402_v14 }
  0x21   :  { %201 = vmatpush.bf16.msra.mxu1 %v393_v7 }
  0x24   :  { %284 = vmatpush.bf16.msra.mxu2 %v401_v15 }
  0x25   :  { %202 = vmatpush.bf16.msra.mxu1 %v392_v8 }
  0x28   :  { %285 = vmatpush.bf16.msra.mxu2 %v400_v16 }
  0x29   :  { %203 = vmatpush.bf16.msra.mxu1 %v391_v9 }
  0x2c   :  { %286 = vmatpush.bf16.msra.mxu2 %v399_v17 }
  0x2d   :  { %204 = vmatpush.bf16.msra.mxu1 %v390_v10 }
  0x30   :  { %287 = vmatpush.bf16.msra.mxu2 %v398_v24 }
  0x31   :  { %205 = vmatpush.bf16.msra.mxu1 %v389_v11 }
  0x34   :  { %288 = vmatpush.bf16.msra.mxu2 %v397_v25 }
  0x98   :  { %v124_v19 = vpop.f32.mrf.mxu0 }
  0x99   :  { %v125_v20 = vadd.f32 %v412_v18, %v124_v19 }
  0x9b   :  { %v128_v21 = vmax.f32 %v125_v20, 0.0 }
  0x9d   :  { %v129_v22 = vpack.c.bf16 %v128_v21, %v128_v21 }
  0x9f   :  { %206 = vmatmul.bf16.vlgmr.msra.gmra.mxu1 %v129_v22 }
  0xa0   :  { %v126_v23 = vpop.f32.mrf.mxu0 }
 0x11c   :  { %v207_v27 = vpop.f32.mrf.mxu1 }
 0x11d   :  { %v208_v28 = vadd.f32 %v413_v26, %v207_v27 }
 0x11f   :  { %v211_v29 = vmax.f32 %v208_v28, 0.0 }
 0x121   :  { %v212_v30 = vpack.c.bf16 %v211_v29, %v211_v29 }
 0x123   :  { %289 = vmatmul.bf16.vlgmr.msra.gmra.mxu2 %v212_v30 }
 0x124   :  { %v209_v31 = vpop.f32.mrf.mxu1 }
 0x1a6   :  { %v290_v33 = vpop.f32.mrf.mxu2 }
 0x1a7   :  { %v291_v34 = vadd.f32 %v414_v32, %v290_v33 }
 0x1a9   :  { %294 = vst [vmem:[#allocation10] sm:$0xff] %v291_v34 }
 0x1aa   :  { %305 = dma.vmem_to_hbm [thread:$0]  %s301_s25, 128, %s303_s28, [#allocation4]  }
 0x1ae   :  { %v292_v35 = vpop.f32.mrf.mxu2 }
 0x1af   :  { %541 = dma.done.wait [#allocation4], 128  }
 0x1b0   :  { %542 = vsyncadd [#allocation4], 4294967168 }
 0x1b1   :  { %310 = vsyncpa [#allocation3], 1 }
 0x1b2   :  { %311 = vsyncpa [#allocation6], 1 }
 0x1b3   :  { %312 = vsyncpa [#allocation9], 1 }
 0x1b4   :  { %313 = vsyncpa [#allocation4], 1 }

</bundles_post_ra>
